<compile_context>
chip_gen: v7x
topology: tpu7x:2x2x1
jax: 0.10.0
libtpu: 0.0.40
codegen_flags: <defaults>
</compile_context>

<pallas_src>
import jax
import jax.numpy as jnp
from jax.experimental import pallas as pl
from jax.experimental.pallas import tpu as pltpu


def _mure_kernel(d_ref, seg_ref, out_ref):
    # d_ref:   (tile, L) lane-packed diff rows (L = pack * D)
    # seg_ref: (L, pack) block matrix of -1.0 (segment membership, negation folded in)
    # out_ref: (tile, pack) = -sum(diff**2) per packed D-wide segment
    d = d_ref[...]
    sq = d * d
    out_ref[...] = jnp.dot(sq, seg_ref[...], preferred_element_type=jnp.float32)


def _round_up(x, m):
    return (x + m - 1) // m * m


def mure_forward(E, Wu, Rv, bs, bo, u_idx, r_idx, v_idx, *, max_tile_rows=8192):
    """MuRE scores for a batch of (u, r, v) triples."""
    B = u_idx.shape[0]
    D = E.shape[1]

    LANE = 128
    pack = LANE // D if (D <= LANE and LANE % D == 0) else 1
    L = pack * D                      # lane width of the packed rows

    # Packed-row count, padded so a tile divides it evenly and the first block
    # dim is a multiple of 8 (sublane rule).
    n_rows = -(-B // pack)
    tile = min(max_tile_rows, _round_up(n_rows, 8))
    # Prefer >= 2 grid steps so the "parallel" batch axis can shard across the
    # two TensorCores on v7x (no-op when the batch is tiny).
    if _round_up(n_rows, tile) // tile < 2:
        half = _round_up(-(-n_rows // 2), 8)
        if 8 <= half < tile:
            tile = half
    n_rows_pad = _round_up(n_rows, tile)
    B_pad = n_rows_pad * pack
    pad = B_pad - B

    u_i = jnp.pad(u_idx, (0, pad))    # pad with index 0 (valid row, discarded)
    r_i = jnp.pad(r_idx, (0, pad))
    v_i = jnp.pad(v_idx, (0, pad))

    # Gathers + elementwise fuse in XLA; the kernel streams ONE f32 slab.
    # The (B_pad, D) -> (n_rows_pad, L) reshape is a free contiguous reinterpretation.
    diff = (E[u_i].astype(jnp.float32) * Wu[r_i].astype(jnp.float32)
            - (E[v_i].astype(jnp.float32) + Rv[r_i].astype(jnp.float32)))
    diff = diff.reshape(n_rows_pad, L)

    # Segmented-reduce matrix with the negation folded in:
    #   out[i, c] = -sum_{l in segment c} diff[i, l]**2
    lane_seg = jnp.arange(L, dtype=jnp.int32)[:, None] // D          # (L, 1)
    col = jnp.arange(pack, dtype=jnp.int32)[None, :]                 # (1, pack)
    seg_neg = -(lane_seg == col).astype(jnp.float32)                 # (L, pack)

    grid = (n_rows_pad // tile,)

    out = pl.pallas_call(
        _mure_kernel,
        out_shape=jax.ShapeDtypeStruct((n_rows_pad, pack), jnp.float32),
        grid_spec=pltpu.PrefetchScalarGridSpec(
            num_scalar_prefetch=0,
            grid=grid,
            in_specs=[
                pl.BlockSpec((tile, L), lambda i: (i, 0)),
                pl.BlockSpec((L, pack), lambda i: (0, 0)),   # VMEM-resident
            ],
            out_specs=pl.BlockSpec((tile, pack), lambda i: (i, 0)),
        ),
        compiler_params=pltpu.CompilerParams(
            dimension_semantics=("parallel",),
            vmem_limit_bytes=32 * 1024 * 1024,
        ),
    )(diff, seg_neg)

    neg_sqdist = out.reshape(-1)[:B]                   # (B,)
    return neg_sqdist + bs[u_idx] + bo[v_idx]


if __name__ == "__main__":
    key = jax.random.PRNGKey(0)
    k_e, k_wu, k_rv, k_u, k_r, k_v = jax.random.split(key, 6)

    num_entities = 10
    num_relations = 5
    dim = 32
    batch = 8

    # Deterministic parameter init mirroring the module's __init__
    # (0.001 * randn for embeddings, uniform(-1,1) for Wu, zeros for biases).
    E = 0.001 * jax.random.normal(k_e, (num_entities, dim), dtype=jnp.float32)
    Wu = jax.random.uniform(k_wu, (num_relations, dim),
                            minval=-1.0, maxval=1.0, dtype=jnp.float32)
    Rv = 0.001 * jax.random.normal(k_rv, (num_relations, dim), dtype=jnp.float32)
    bs = jnp.zeros((num_entities,), dtype=jnp.float32)
    bo = jnp.zeros((num_entities,), dtype=jnp.float32)

    u_idx = jax.random.randint(k_u, (batch,), 0, num_entities)
    r_idx = jax.random.randint(k_r, (batch,), 0, num_relations)
    v_idx = jax.random.randint(k_v, (batch,), 0, num_entities)

    out = mure_forward(E, Wu, Rv, bs, bo, u_idx, r_idx, v_idx)
    jax.block_until_ready(out)

    # Pure-JAX f32 reference check (PyTorch ref is f64; f32 tolerance applies).
    ref = (-jnp.sum((E[u_idx] * Wu[r_idx] - (E[v_idx] + Rv[r_idx])) ** 2, axis=-1)
           + bs[u_idx] + bo[v_idx])
    assert out.shape == (batch,)
    assert jnp.allclose(out, ref, rtol=1e-3, atol=1e-6), (out, ref)

    print("KERNEL_OK")
</pallas_src>

<mosaic_0001>
module attributes {stable_mosaic.version = 11 : i64} {
  func.func @_mure_kernel(%arg0: i32, %arg1: memref<8x128xf32, #tpu.memory_space<vmem>>, %arg2: memref<128x4xf32, #tpu.memory_space<vmem>>, %arg3: memref<8x4xf32, #tpu.memory_space<vmem>>) attributes {dimension_semantics = [#tpu.dimension_semantics<parallel>], iteration_bounds = array<i64: 1>, scalar_prefetch = 0 : i64, scratch_operands = 0 : i64, tpu.core_type = #tpu.core_type<tc>, window_params = [{transform_indices = @transform_0, window_bounds = array<i64: 8, 128>}, {pipeline_mode = #tpu.pipeline_mode<synchronous>, transform_indices = @transform_1, window_bounds = array<i64: 128, 4>}, {transform_indices = @transform_2, window_bounds = array<i64: 8, 4>}]} {
    %c0 = arith.constant 0 : index
    %c0_0 = arith.constant 0 : index
    %0 = vector.load %arg1[%c0, %c0_0] : memref<8x128xf32, #tpu.memory_space<vmem>>, vector<8x128xf32>
    %1 = arith.mulf %0, %0 : vector<8x128xf32>
    %c0_1 = arith.constant 0 : index
    %c0_2 = arith.constant 0 : index
    %2 = vector.load %arg2[%c0_1, %c0_2] : memref<128x4xf32, #tpu.memory_space<vmem>>, vector<128x4xf32>
    %cst = arith.constant dense<0.000000e+00> : vector<8x4xf32>
    %3 = tpu.matmul %1, %2, %cst {dimension_numbers = #tpu.dot_dimension_numbers<[1], [0], [0], [1], [0, 0, 1, 1], [], []>} : vector<8x128xf32>, vector<128x4xf32>, vector<8x4xf32> -> vector<8x4xf32>
    %c0_3 = arith.constant 0 : index
    %c0_4 = arith.constant 0 : index
    %4 = vector.load %arg3[%c0_3, %c0_4] : memref<8x4xf32, #tpu.memory_space<vmem>>, vector<8x4xf32>
    tpu.vector_store %arg3[%c0_3, %c0_4], %3 {strides = array<i32>} : memref<8x4xf32, #tpu.memory_space<vmem>>, vector<8x4xf32>,
    return
  }
  func.func @transform_0(%arg0: i32) -> (i32, i32) {
    %c0_i32 = arith.constant 0 : i32
    %c0_i32_0 = arith.constant 0 : i32
    return %arg0, %c0_i32 : i32, i32
  }
  func.func @transform_1(%arg0: i32) -> (i32, i32) {
    %c0_i32 = arith.constant 0 : i32
    %c0_i32_0 = arith.constant 0 : i32
    %c0_i32_1 = arith.constant 0 : i32
    return %c0_i32, %c0_i32_0 : i32, i32
  }
  func.func @transform_2(%arg0: i32) -> (i32, i32) {
    %c0_i32 = arith.constant 0 : i32
    %c0_i32_0 = arith.constant 0 : i32
    return %arg0, %c0_i32 : i32, i32
  }
}

</mosaic_0001>

<bundles_post_ra>
// kernel: tpu_custom_call.1
= control target key start
LH: loop header
LB: loop body
LE: loop exit
PB: predicated region body
PF: predicated region fallthrough
CT: control target
= control target key end

     0   :  { %v184_v0 = vmov 0.0|0.0   ;;  %vm185_vm0 = vmmov 0   ;;  %v186_v4 = vmov 0.0   ;;  %vm99_vm1 = vcmask 31744   ;;  %s256_s1 = inlined_call_operand.vmem [shape: f32[128,4], index: 1, kind: input, shape index: {}]   ;;  %s257_s0 = inlined_call_operand.vmem [shape: f32[8,128], index: 0, kind: input, shape index: {}]   ;;  %s258_s2 = inlined_call_operand.vmem [shape: f32[8,4], index: 2, kind: output, shape index: {}]  }
   0x1   :  { %157 = vmatprep.subr.bf16.mxu0 %v184_v0  ;;  %v13_v1 = vld [vmem:[%s256_s1] sm:$0xff]  ;;  %v14_v2 = vld [vmem:[%s256_s1 + $0x8] sm:$0xff]  ;;  %v15_v3 = vld [vmem:[%s256_s1 + $0x10] sm:$0xff]  ;;  %154 = vmatprep.mubr.msk.f32.mxu0 %vm185_vm0, %v186_v4 }
   0x2   :  { %v158_v5 = vpack.c.bf16 %v14_v2, %v13_v1  ;;  %v16_v6 = vld [vmem:[%s256_s1 + $0x18] sm:$0xff]  ;;  %v17_v8 = vld [vmem:[%s256_s1 + $0x20] sm:$0xff]  ;;  %v18_v9 = vld [vmem:[%s256_s1 + $0x28] sm:$0xff] }
   0x3   :  { %v161_v7 = vpack.c.bf16 %v16_v6, %v15_v3  ;;  %v164_v10 = vpack.c.bf16 %v18_v9, %v17_v8  ;;  %v19_v11 = vld [vmem:[%s256_s1 + $0x30] sm:$0xff]  ;;  %v20_v12 = vld [vmem:[%s256_s1 + $0x38] sm:$0xff]  ;;  %v21_v14 = vld [vmem:[%s256_s1 + $0x40] sm:$0xff] }
   0x4   :  { %159 = vmatpush3.bf16.msra.mxu0 %v158_v5  ;;  %v167_v13 = vpack.c.bf16 %v20_v12, %v19_v11  ;;  %v22_v15 = vld [vmem:[%s256_s1 + $0x48] sm:$0xff]  ;;  %v23_v17 = vld [vmem:[%s256_s1 + $0x50] sm:$0xff]  ;;  %v24_v18 = vld [vmem:[%s256_s1 + $0x58] sm:$0xff] }
   0x5   :  { %160 = vmatprep.subr.bf16.mxu0 %v184_v0  ;;  %v170_v16 = vpack.c.bf16 %v22_v15, %v21_v14  ;;  %v173_v19 = vpack.c.bf16 %v24_v18, %v23_v17  ;;  %v25_v20 = vld [vmem:[%s256_s1 + $0x60] sm:$0xff]  ;;  %v26_v21 = vld [vmem:[%s256_s1 + $0x68] sm:$0xff]  ;;  %v27_v23 = vld [vmem:[%s256_s1 + $0x70] sm:$0xff] }
   0x6   :  { %v176_v22 = vpack.c.bf16 %v26_v21, %v25_v20  ;;  %v28_v24 = vld [vmem:[%s256_s1 + $0x78] sm:$0xff]  ;;  %v11_v26 = vld [vmem:[%s257_s0] sm:$0xff] }
   0x7   :  { %v179_v25 = vpack.c.bf16 %v28_v24, %v27_v23  ;;  %v12_v27 = vmul.f32 %v11_v26, %v11_v26 }
   0x8   :  { %162 = vmatpush3.bf16.msra.mxu0 %v161_v7 }
   0x9   :  { %163 = vmatprep.subr.bf16.mxu0 %v184_v0 }
   0xc   :  { %165 = vmatpush3.bf16.msra.mxu0 %v164_v10 }
   0xd   :  { %166 = vmatprep.subr.bf16.mxu0 %v184_v0 }
  0x10   :  { %168 = vmatpush3.bf16.msra.mxu0 %v167_v13 }
  0x11   :  { %169 = vmatprep.subr.bf16.mxu0 %v184_v0 }
  0x14   :  { %171 = vmatpush3.bf16.msra.mxu0 %v170_v16 }
  0x15   :  { %172 = vmatprep.subr.bf16.mxu0 %v184_v0 }
  0x18   :  { %174 = vmatpush3.bf16.msra.mxu0 %v173_v19 }
  0x19   :  { %175 = vmatprep.subr.bf16.mxu0 %v184_v0 }
  0x1c   :  { %177 = vmatpush3.bf16.msra.mxu0 %v176_v22 }
  0x1d   :  { %178 = vmatprep.subr.bf16.mxu0 %v184_v0 }
  0x20   :  { %180 = vmatpush3.bf16.msra.mxu0 %v179_v25 }
  0x23   :  { %155 = vmatmul.mubr.f32.vlgmr.msra.gmra.mrb[0].mxu0 %v12_v27 }
  0xf6   :  { %v95_v28 = vpop.f32.mrb[0].mxu0 }
  0xf7   :  { %100 = vst.msk [vmem:[%s258_s2] sm:$0xff] %vm99_vm1, %v95_v28  ;;  %v156_v29 = vpop.f32.mrb[1].mxu0 }

</bundles_post_ra>
